<compile_context>
chip_gen: v6e
topology: v6e:2x2x1
jax: 0.10.0
libtpu: 0.0.40
codegen_flags: <defaults>
</compile_context>

<pallas_src>
import jax
import jax.numpy as jnp
from jax.experimental import pallas as pl
from jax.experimental.pallas import tpu as pltpu


# -----------------------------------------------------------------------------
# Fused Encoder kernel: (sym, p_sym, constellation) -> (enc, norm_constellation)
# -----------------------------------------------------------------------------
def _encoder_kernel(sym_ref, p_ref, c_ref, enc_ref, nc_ref):
    c = c_ref[...]                                   # (M, 2)  columns = [re, im]
    p = p_ref[...]                                   # (1, M)  symbol probabilities

    # power = sum_m p[m] * |c_m|^2
    #   (1, M) @ (M, 2) on the MXU gives per-component p-weighted energy,
    #   then a tiny lane reduce collapses re/im.
    e_ri = jnp.dot(p, c * c, preferred_element_type=jnp.float32)   # (1, 2)
    power = jnp.sum(e_ri, axis=-1, keepdims=True)                  # (1, 1)

    # norm_factor = rsqrt(power)  -> EUP (free slot in this latency-bound kernel)
    nf = jax.lax.rsqrt(power)                                      # (1, 1)

    # normalized constellation (real/imag columns)
    nc = c * nf                                                    # (M, 2)
    nc_ref[...] = nc

    # enc = sym @ norm_constellation_real   ->  (B, 2) == [Re(enc), Im(enc)]
    # (complex(enc[:,0], enc[:,1]) followed by complex2real in torch is the
    #  identity on this real representation, so no extra work is needed.)
    enc_ref[...] = jnp.dot(sym_ref[...], nc, preferred_element_type=jnp.float32)


# -----------------------------------------------------------------------------
# Wrapper
# -----------------------------------------------------------------------------
_VMEM_SPEC = pl.BlockSpec(memory_space=pltpu.MemorySpace.VMEM)


def encoder_forward(sym, p_sym, constellation_real):
    """Pallas equivalent of Encoder.forward(sym, p_sym).

    Args:
      sym:                (B, M) float32, (approximately) one-hot symbol selections.
      p_sym:              (1, M) float32, symbol probability distribution.
      constellation_real: (M, 2) float32, QAM constellation as [real, imag].

    Returns:
      enc:                (B, 2) float32, encoded (normalized) symbols [re, im].
      norm_constellation: (M, 2) float32, power-normalized constellation [re, im].
    """
    B = sym.shape[0]
    M = constellation_real.shape[0]
    return pl.pallas_call(
        _encoder_kernel,
        out_shape=(
            jax.ShapeDtypeStruct((B, 2), jnp.float32),   # enc
            jax.ShapeDtypeStruct((M, 2), jnp.float32),   # norm_constellation
        ),
        in_specs=[_VMEM_SPEC, _VMEM_SPEC, _VMEM_SPEC],
        out_specs=(_VMEM_SPEC, _VMEM_SPEC),
    )(sym, p_sym, constellation_real)


# -----------------------------------------------------------------------------
# Host-side constant: square QAM constellation (stand-in for tu.qamConst(M)),
# returned as an (M, 2) real array [real, imag].  Pure constant data.
# -----------------------------------------------------------------------------
def qam_constellation(M):
    m = int(round(M ** 0.5))
    assert m * m == M, "M must be a square number for square QAM"
    levels = jnp.arange(-(m - 1), m, 2, dtype=jnp.float32)   # e.g. [-3,-1,1,3]
    re, im = jnp.meshgrid(levels, levels, indexing="xy")
    return jnp.stack([re.reshape(-1), im.reshape(-1)], axis=-1).astype(jnp.float32)


if __name__ == "__main__":
    M = 16          # chParam.M (16-QAM)
    B = 8           # batch of symbols coming from the PCS_NN gumbel-softmax

    root = jax.random.PRNGKey(0)
    k_idx, k_logits = jax.random.split(root)

    constellation = qam_constellation(M)                        # (M, 2)

    # sym: one-hot rows (what the upstream straight-through sampler produces)
    idx = jax.random.randint(k_idx, (B,), 0, M)
    sym = jax.nn.one_hot(idx, M, dtype=jnp.float32)             # (B, M)

    # p_sym: probability vector over the M constellation points
    p_sym = jax.nn.softmax(
        jax.random.normal(k_logits, (1, M), dtype=jnp.float32), axis=-1)

    enc, norm_const = encoder_forward(sym, p_sym, constellation)
    enc = jax.block_until_ready(enc)
    norm_const = jax.block_until_ready(norm_const)

    # Pure-JAX reference check (same math as the torch module).
    abs2 = jnp.sum(constellation * constellation, axis=-1)       # |c|^2, (M,)
    nf_ref = jax.lax.rsqrt(jnp.sum(p_sym[0] * abs2))
    nc_ref = nf_ref * constellation
    enc_ref = sym @ nc_ref

    assert enc.shape == (B, 2)
    assert norm_const.shape == (M, 2)
    assert jnp.allclose(norm_const, nc_ref, atol=1e-4, rtol=1e-4)
    assert jnp.allclose(enc, enc_ref, atol=1e-4, rtol=1e-4)

    print("KERNEL_OK")
</pallas_src>

<mosaic_0001>
module attributes {stable_mosaic.version = 11 : i64} {
  func.func @_encoder_kernel(%arg0: memref<8x16xf32, #tpu.memory_space<vmem>>, %arg1: memref<1x16xf32, #tpu.memory_space<vmem>>, %arg2: memref<16x2xf32, #tpu.memory_space<vmem>>, %arg3: memref<8x2xf32, #tpu.memory_space<vmem>>, %arg4: memref<16x2xf32, #tpu.memory_space<vmem>>) attributes {dimension_semantics = [], scalar_prefetch = 0 : i64, scratch_operands = 0 : i64, tpu.core_type = #tpu.core_type<tc>} {
    %c0 = arith.constant 0 : index
    %c0_0 = arith.constant 0 : index
    %0 = vector.load %arg2[%c0, %c0_0] : memref<16x2xf32, #tpu.memory_space<vmem>>, vector<16x2xf32>
    %c0_1 = arith.constant 0 : index
    %c0_2 = arith.constant 0 : index
    %1 = vector.load %arg1[%c0_1, %c0_2] : memref<1x16xf32, #tpu.memory_space<vmem>>, vector<1x16xf32>
    %2 = arith.mulf %0, %0 : vector<16x2xf32>
    %cst = arith.constant dense<0.000000e+00> : vector<1x2xf32>
    %3 = tpu.matmul %1, %2, %cst {dimension_numbers = #tpu.dot_dimension_numbers<[1], [0], [0], [1], [0, 0, 1, 1], [], []>} : vector<1x16xf32>, vector<16x2xf32>, vector<1x2xf32> -> vector<1x2xf32>
    %cst_3 = arith.constant dense<0.000000e+00> : vector<1xf32>
    %4 = vector.multi_reduction <add>, %3, %cst_3 [1] : vector<1x2xf32> to vector<1xf32>
    %5 = vector.shape_cast %4 : vector<1xf32> to vector<1x1xf32>
    %6 = math.rsqrt %5 : vector<1x1xf32>
    %7 = vector.broadcast %6 : vector<1x1xf32> to vector<16x2xf32>
    %8 = arith.mulf %0, %7 : vector<16x2xf32>
    %c0_4 = arith.constant 0 : index
    %c0_5 = arith.constant 0 : index
    %9 = vector.load %arg4[%c0_4, %c0_5] : memref<16x2xf32, #tpu.memory_space<vmem>>, vector<16x2xf32>
    tpu.vector_store %arg4[%c0_4, %c0_5], %8 {strides = array<i32>} : memref<16x2xf32, #tpu.memory_space<vmem>>, vector<16x2xf32>,
    %c0_6 = arith.constant 0 : index
    %c0_7 = arith.constant 0 : index
    %10 = vector.load %arg0[%c0_6, %c0_7] : memref<8x16xf32, #tpu.memory_space<vmem>>, vector<8x16xf32>
    %cst_8 = arith.constant dense<0.000000e+00> : vector<8x2xf32>
    %11 = tpu.matmul %10, %8, %cst_8 {dimension_numbers = #tpu.dot_dimension_numbers<[1], [0], [0], [1], [0, 0, 1, 1], [], []>} : vector<8x16xf32>, vector<16x2xf32>, vector<8x2xf32> -> vector<8x2xf32>
    %c0_9 = arith.constant 0 : index
    %c0_10 = arith.constant 0 : index
    %12 = vector.load %arg3[%c0_9, %c0_10] : memref<8x2xf32, #tpu.memory_space<vmem>>, vector<8x2xf32>
    tpu.vector_store %arg3[%c0_9, %c0_10], %11 {strides = array<i32>} : memref<8x2xf32, #tpu.memory_space<vmem>>, vector<8x2xf32>,
    return
  }
}

</mosaic_0001>

<bundles_post_ra>
// kernel: tpu_custom_call.1
= control target key start
LH: loop header
LB: loop body
LE: loop exit
PB: predicated region body
PF: predicated region fallthrough
CT: control target
= control target key end

     0   :  { %v218_v0 = vmov 0.0   ;;  %vm219_vm0 = vmmov 0   ;;  %vm21_vm1 = vcmask 130048   ;;  %vm95_vm2 = vcmask 8192   ;;  %s268_s2 = inlined_call_operand.vmem [shape: f32[16,2], index: 2, kind: input, shape index: {}]   ;;  %s269_s1 = inlined_call_operand.vmem [shape: f32[1,16], index: 1, kind: input, shape index: {}]   ;;  %s270_s0 = inlined_call_operand.vmem [shape: f32[8,16], index: 0, kind: input, shape index: {}]   ;;  %s271_s4 = inlined_call_operand.vmem [shape: f32[16,2], index: 4, kind: output, shape index: {1}]   ;;  %s272_s3 = inlined_call_operand.vmem [shape: f32[8,2], index: 3, kind: output, shape index: {0}]  }
   0x1   :  { %200 = vmatprep.subr.mxu0 %v218_v0  ;;  %v16_v1 = vld [vmem:[%s268_s2] sm:$0xff]  ;;  %v17_v2 = vld [vmem:[%s268_s2 + $0x8] sm:$0xff]  ;;  %204 = vmatprep.mubr.msk.f32.mxu0 %vm219_vm0, %v218_v0  ;;  %v100_v10 = vlaneseq  ;;  %vm106_vm3 = vcmask 15360  }
   0x2   :  { %v20_v3 = vmul.f32 %v17_v2, %v17_v2  ;;  %v19_v4 = vmul.f32 %v16_v1, %v16_v1  ;;  %207 = vmatprep.subr.mxu1 %v218_v0  ;;  %211 = vmatprep.mubr.msk.f32.mxu1 %vm219_vm0, %v218_v0  ;;  %v18_v5 = vld [vmem:[%s269_s1] sm:$0x1] }
   0x3   :  { %v101_v11 = vshrl.u32 %v100_v10, 7  ;;  %v109_v17 = vld [vmem:[%s270_s0] sm:$0xff] }
   0x4   :  { %201 = vmatpush3.msra.mxu0 %v20_v3 }
   0x5   :  { %202 = vmatprep.subr.mxu0 %v218_v0  ;;  %v102_v12 = vsub.s32 0, %v101_v11 }
   0x6   :  { %203 = vmatpush3.msra.mxu0 %v19_v4 }
   0x7   :  { %205 = vmatmul.mubr.msk.f32.vlgmr.msra.gmra.mxu0 %vm21_vm1, %v18_v5 }
  0xc7   :  { %v91_v6 = vpop.f32.mrf.mxu0 }
  0xc8   :  { %v96_v7 = vsel %vm95_vm2, %v91_v6, 0.0 }
  0xc9   :  { %v206_v8 = vpop.f32.mrf.mxu0  ;;  %97 = vadd.xlane.f32.xlu0 %v96_v7 }
 0x152   :  { %v98_v9 = vpop.xlane.xlu0 %97 }
 0x153   :  { %216 = vrsqrt.f32 %v98_v9 }
 0x160   :  { %v217_v13 = vpop.eup %216 }
 0x161   :  { %v103_v14 = vrot.slane %v217_v13, %v102_v12 }
 0x163   :  { %v105_v15 = vmul.f32 %v103_v14, %v17_v2  ;;  %v104_v16 = vmul.f32 %v103_v14, %v16_v1 }
 0x165   :  { %208 = vmatpush3.msra.mxu1 %v105_v15  ;;  %107 = vst.msk [vmem:[%s271_s4] sm:$0xff] %vm106_vm3, %v104_v16  ;;  %108 = vst.msk [vmem:[%s271_s4 + $0x8] sm:$0xff] %vm106_vm3, %v105_v15 }
 0x166   :  { %209 = vmatprep.subr.mxu1 %v218_v0 }
 0x167   :  { %210 = vmatpush3.msra.mxu1 %v104_v16 }
 0x168   :  { %212 = vmatmul.mubr.msk.f32.vlgmr.msra.gmra.mxu1 %vm21_vm1, %v109_v17 }
 0x228   :  { %v179_v18 = vpop.f32.mrf.mxu1 }
 0x229   :  { %183 = vst.msk [vmem:[%s272_s3] sm:$0xff] %vm106_vm3, %v179_v18 }
 0x22a   :  { %v213_v19 = vpop.f32.mrf.mxu1 }

</bundles_post_ra>
